<compile_context>
chip_gen: v6e
topology: v6e:2x2x1
jax: 0.10.0
libtpu: 0.0.40
codegen_flags: <defaults>
</compile_context>

<pallas_src>
import jax
import jax.numpy as jnp
from jax.experimental import pallas as pl
from jax.experimental.pallas import tpu as pltpu

_LANE = 128
_SUBLANE_BF16 = 16  # bf16 packs 16 rows per sublane-tile


def _round_up(n, m):
    return ((n + m - 1) // m) * m


def _mlp_kernel(x_ref, w1_ref, b1_ref, w2_ref, b2_ref,
                w3_ref, b3_ref, w4_ref, b4_ref, o_ref):
    # bf16 operands into the MXU, f32 accumulation; bias add + ReLU in f32,
    # re-cast to bf16 between layers for the next MXU pass.
    x = x_ref[...]                                                   # (tb, in) bf16
    h = jnp.dot(x, w1_ref[...], preferred_element_type=jnp.float32) + b1_ref[...]
    h = jnp.maximum(h, 0.0).astype(jnp.bfloat16)
    h = jnp.dot(h, w2_ref[...], preferred_element_type=jnp.float32) + b2_ref[...]
    h = jnp.maximum(h, 0.0).astype(jnp.bfloat16)
    h = jnp.dot(h, w3_ref[...], preferred_element_type=jnp.float32) + b3_ref[...]
    h = jnp.maximum(h, 0.0).astype(jnp.bfloat16)
    o_ref[...] = (jnp.dot(h, w4_ref[...], preferred_element_type=jnp.float32)
                  + b4_ref[...]).astype(o_ref.dtype)


def prepare_params(params):
    """One-time preparation: pad the hidden dim to 128 lanes, cast matmul
    operands to bf16, keep biases in f32.  Call once, reuse for every forward.
    Expects w1..w4 as (in, out) and b1..b4 as (1, out) (transposed vs torch)."""
    in_dim, hid_dim = params["w1"].shape
    out_dim = params["w4"].shape[1]
    dp_h = _round_up(hid_dim, _LANE)

    def pad_cast(a, rows, cols, dtype):
        a = a.astype(jnp.float32)
        a = jnp.pad(a, ((0, rows - a.shape[0]), (0, cols - a.shape[1])))
        return a.astype(dtype)

    return {
        "w1": pad_cast(params["w1"], in_dim, dp_h, jnp.bfloat16),
        "b1": pad_cast(params["b1"], 1, dp_h, jnp.float32),
        "w2": pad_cast(params["w2"], dp_h, dp_h, jnp.bfloat16),
        "b2": pad_cast(params["b2"], 1, dp_h, jnp.float32),
        "w3": pad_cast(params["w3"], dp_h, dp_h, jnp.bfloat16),
        "b3": pad_cast(params["b3"], 1, dp_h, jnp.float32),
        "w4": pad_cast(params["w4"], dp_h, out_dim, jnp.bfloat16),
        "b4": params["b4"].astype(jnp.float32),
        "dims": (in_dim, dp_h, out_dim),
    }


def nn_forward(x, prepared, *, tile_batch=1024):
    """Fused Pallas forward pass of the 4-layer MLP.

    x: (B, INPUT_DIM); prepared: output of prepare_params(params).
    Returns (B, OUTPUT_DIM) float32.
    """
    in_dim, dp_h, out_dim = prepared["dims"]
    x = jnp.asarray(x, jnp.float32)  # mirrors torch.tensor(x, dtype=float32)
    B = x.shape[0]
    assert x.shape[1] == in_dim

    # Balanced ragged-batch tiling: split B into near-equal tiles instead of
    # full tile_batch tiles + heavy padding.
    num_tiles = max(1, pl.cdiv(B, tile_batch))
    # Make sure v7x's second TensorCore gets work when the batch is big
    # enough; an extra ~0.35us grid step is noise on single-core v5e/v6e.
    if num_tiles == 1 and B >= 256:
        num_tiles = 2
    tb = _round_up(pl.cdiv(B, num_tiles), _SUBLANE_BF16)
    b_pad = num_tiles * tb

    xp = x.astype(jnp.bfloat16)
    if b_pad != B:
        xp = jnp.pad(xp, ((0, b_pad - B), (0, 0)))

    def resident(shape):
        # Constant index_map -> same block every grid step -> stays VMEM
        # resident, no re-DMA across batch tiles.
        return pl.BlockSpec(shape, lambda i: (0, 0))

    out = pl.pallas_call(
        _mlp_kernel,
        out_shape=jax.ShapeDtypeStruct((b_pad, out_dim), jnp.float32),
        grid=(num_tiles,),
        in_specs=[
            pl.BlockSpec((tb, in_dim), lambda i: (i, 0)),      # x: batch-tiled
            resident((in_dim, dp_h)), resident((1, dp_h)),     # w1, b1
            resident((dp_h, dp_h)),   resident((1, dp_h)),     # w2, b2
            resident((dp_h, dp_h)),   resident((1, dp_h)),     # w3, b3
            resident((dp_h, out_dim)), resident((1, out_dim)),  # w4, b4
        ],
        out_specs=pl.BlockSpec((tb, out_dim), lambda i: (i, 0)),
        compiler_params=pltpu.CompilerParams(
            dimension_semantics=("parallel",),  # megacore sharding on v7x
        ),
    )(xp, prepared["w1"], prepared["b1"], prepared["w2"], prepared["b2"],
      prepared["w3"], prepared["b3"], prepared["w4"], prepared["b4"])

    # Only a (small) row slice remains, and only if the batch was padded.
    return out if b_pad == B else out[:B]


def init_params(key, input_dim, output_dim):
    """Torch-Linear-like init; weights stored transposed (in, out), bias (1, out)."""
    dims = [
        (input_dim, 2 * input_dim),
        (2 * input_dim, 2 * input_dim),
        (2 * input_dim, 2 * input_dim),
        (2 * input_dim, output_dim),
    ]
    params = {}
    for i, (fan_in, fan_out) in enumerate(dims, start=1):
        key, kw, kb = jax.random.split(key, 3)
        bound = 1.0 / (fan_in ** 0.5)
        params[f"w{i}"] = jax.random.uniform(
            kw, (fan_in, fan_out), jnp.float32, -bound, bound)
        params[f"b{i}"] = jax.random.uniform(
            kb, (1, fan_out), jnp.float32, -bound, bound)
    return params


def nn_forward_ref(x, params):
    """Pure-JAX f32 reference of the same forward pass (the module spec)."""
    h = x.astype(jnp.float32)
    h = jnp.maximum(h @ params["w1"] + params["b1"], 0.0)
    h = jnp.maximum(h @ params["w2"] + params["b2"], 0.0)
    h = jnp.maximum(h @ params["w3"] + params["b3"], 0.0)
    return h @ params["w4"] + params["b4"]


# TODO(synk): the module's fit()/Adam/MSE training loop, clone(), and
# save/load are host-side training utilities, not part of the forward pass,
# and are intentionally not implemented as kernels.

if __name__ == "__main__":
    INPUT_DIM = 32
    OUTPUT_DIM = 8

    key = jax.random.PRNGKey(0)
    key, kp = jax.random.split(key)
    params = init_params(kp, INPUT_DIM, OUTPUT_DIM)
    prepared = prepare_params(params)  # one-time pad + bf16 cast

    # Case 1: tiny batch (single-tile path, batch padding to sublane multiple).
    key, kx = jax.random.split(key)
    x_small = jax.random.normal(kx, (8, INPUT_DIM), jnp.float32)
    out_small = jax.block_until_ready(nn_forward(x_small, prepared))
    ref_small = nn_forward_ref(x_small, params)
    assert out_small.shape == (8, OUTPUT_DIM)
    # bf16 matmul operands (f32 accumulation) -> relaxed tolerance vs f32 ref.
    assert jnp.allclose(out_small, ref_small, atol=5e-2, rtol=5e-2)

    # Case 2: ragged batch exercising balanced tiles + 2-tile parallel grid.
    key, kx2 = jax.random.split(key)
    x_big = jax.random.normal(kx2, (520, INPUT_DIM), jnp.float32)
    out_big = jax.block_until_ready(nn_forward(x_big, prepared, tile_batch=1024))
    ref_big = nn_forward_ref(x_big, params)
    assert out_big.shape == (520, OUTPUT_DIM)
    assert jnp.allclose(out_big, ref_big, atol=5e-2, rtol=5e-2)

    print("KERNEL_OK")
</pallas_src>

<mosaic_0001>
module attributes {stable_mosaic.version = 11 : i64} {
  func.func @_mlp_kernel(%arg0: i32, %arg1: memref<16x32xbf16, #tpu.memory_space<vmem>>, %arg2: memref<32x128xbf16, #tpu.memory_space<vmem>>, %arg3: memref<1x128xf32, #tpu.memory_space<vmem>>, %arg4: memref<128x128xbf16, #tpu.memory_space<vmem>>, %arg5: memref<1x128xf32, #tpu.memory_space<vmem>>, %arg6: memref<128x128xbf16, #tpu.memory_space<vmem>>, %arg7: memref<1x128xf32, #tpu.memory_space<vmem>>, %arg8: memref<128x8xbf16, #tpu.memory_space<vmem>>, %arg9: memref<1x8xf32, #tpu.memory_space<vmem>>, %arg10: memref<16x8xf32, #tpu.memory_space<vmem>>) attributes {dimension_semantics = [#tpu.dimension_semantics<parallel>], iteration_bounds = array<i64: 1>, scalar_prefetch = 0 : i64, scratch_operands = 0 : i64, tpu.core_type = #tpu.core_type<tc>, window_params = [{transform_indices = @transform_0, window_bounds = array<i64: 16, 32>}, {pipeline_mode = #tpu.pipeline_mode<synchronous>, transform_indices = @transform_1, window_bounds = array<i64: 32, 128>}, {pipeline_mode = #tpu.pipeline_mode<synchronous>, transform_indices = @transform_2, window_bounds = array<i64: 1, 128>}, {pipeline_mode = #tpu.pipeline_mode<synchronous>, transform_indices = @transform_3, window_bounds = array<i64: 128, 128>}, {pipeline_mode = #tpu.pipeline_mode<synchronous>, transform_indices = @transform_4, window_bounds = array<i64: 1, 128>}, {pipeline_mode = #tpu.pipeline_mode<synchronous>, transform_indices = @transform_5, window_bounds = array<i64: 128, 128>}, {pipeline_mode = #tpu.pipeline_mode<synchronous>, transform_indices = @transform_6, window_bounds = array<i64: 1, 128>}, {pipeline_mode = #tpu.pipeline_mode<synchronous>, transform_indices = @transform_7, window_bounds = array<i64: 128, 8>}, {pipeline_mode = #tpu.pipeline_mode<synchronous>, transform_indices = @transform_8, window_bounds = array<i64: 1, 8>}, {transform_indices = @transform_9, window_bounds = array<i64: 16, 8>}]} {
    %c0 = arith.constant 0 : index
    %c0_0 = arith.constant 0 : index
    %0 = vector.load %arg1[%c0, %c0_0] : memref<16x32xbf16, #tpu.memory_space<vmem>>, vector<16x32xbf16>
    %c0_1 = arith.constant 0 : index
    %c0_2 = arith.constant 0 : index
    %1 = vector.load %arg2[%c0_1, %c0_2] : memref<32x128xbf16, #tpu.memory_space<vmem>>, vector<32x128xbf16>
    %cst = arith.constant dense<0.000000e+00> : vector<16x128xf32>
    %2 = tpu.matmul %0, %1, %cst {dimension_numbers = #tpu.dot_dimension_numbers<[1], [0], [0], [1], [0, 0, 1, 1], [], []>} : vector<16x32xbf16>, vector<32x128xbf16>, vector<16x128xf32> -> vector<16x128xf32>
    %c0_3 = arith.constant 0 : index
    %c0_4 = arith.constant 0 : index
    %3 = vector.load %arg3[%c0_3, %c0_4] : memref<1x128xf32, #tpu.memory_space<vmem>>, vector<1x128xf32>
    %4 = vector.broadcast %3 : vector<1x128xf32> to vector<16x128xf32>
    %5 = arith.addf %2, %4 : vector<16x128xf32>
    %cst_5 = arith.constant 0.000000e+00 : f32
    %6 = vector.broadcast %cst_5 : f32 to vector<16x128xf32>
    %7 = arith.maximumf %5, %6 : vector<16x128xf32>
    %8 = arith.truncf %7 : vector<16x128xf32> to vector<16x128xbf16>
    %c0_6 = arith.constant 0 : index
    %c0_7 = arith.constant 0 : index
    %9 = vector.load %arg4[%c0_6, %c0_7] : memref<128x128xbf16, #tpu.memory_space<vmem>>, vector<128x128xbf16>
    %cst_8 = arith.constant dense<0.000000e+00> : vector<16x128xf32>
    %10 = tpu.matmul %8, %9, %cst_8 {dimension_numbers = #tpu.dot_dimension_numbers<[1], [0], [0], [1], [0, 0, 1, 1], [], []>} : vector<16x128xbf16>, vector<128x128xbf16>, vector<16x128xf32> -> vector<16x128xf32>
    %c0_9 = arith.constant 0 : index
    %c0_10 = arith.constant 0 : index
    %11 = vector.load %arg5[%c0_9, %c0_10] : memref<1x128xf32, #tpu.memory_space<vmem>>, vector<1x128xf32>
    %12 = vector.broadcast %11 : vector<1x128xf32> to vector<16x128xf32>
    %13 = arith.addf %10, %12 : vector<16x128xf32>
    %cst_11 = arith.constant 0.000000e+00 : f32
    %14 = vector.broadcast %cst_11 : f32 to vector<16x128xf32>
    %15 = arith.maximumf %13, %14 : vector<16x128xf32>
    %16 = arith.truncf %15 : vector<16x128xf32> to vector<16x128xbf16>
    %c0_12 = arith.constant 0 : index
    %c0_13 = arith.constant 0 : index
    %17 = vector.load %arg6[%c0_12, %c0_13] : memref<128x128xbf16, #tpu.memory_space<vmem>>, vector<128x128xbf16>
    %cst_14 = arith.constant dense<0.000000e+00> : vector<16x128xf32>
    %18 = tpu.matmul %16, %17, %cst_14 {dimension_numbers = #tpu.dot_dimension_numbers<[1], [0], [0], [1], [0, 0, 1, 1], [], []>} : vector<16x128xbf16>, vector<128x128xbf16>, vector<16x128xf32> -> vector<16x128xf32>
    %c0_15 = arith.constant 0 : index
    %c0_16 = arith.constant 0 : index
    %19 = vector.load %arg7[%c0_15, %c0_16] : memref<1x128xf32, #tpu.memory_space<vmem>>, vector<1x128xf32>
    %20 = vector.broadcast %19 : vector<1x128xf32> to vector<16x128xf32>
    %21 = arith.addf %18, %20 : vector<16x128xf32>
    %cst_17 = arith.constant 0.000000e+00 : f32
    %22 = vector.broadcast %cst_17 : f32 to vector<16x128xf32>
    %23 = arith.maximumf %21, %22 : vector<16x128xf32>
    %24 = arith.truncf %23 : vector<16x128xf32> to vector<16x128xbf16>
    %c0_18 = arith.constant 0 : index
    %c0_19 = arith.constant 0 : index
    %25 = vector.load %arg8[%c0_18, %c0_19] : memref<128x8xbf16, #tpu.memory_space<vmem>>, vector<128x8xbf16>
    %cst_20 = arith.constant dense<0.000000e+00> : vector<16x8xf32>
    %26 = tpu.matmul %24, %25, %cst_20 {dimension_numbers = #tpu.dot_dimension_numbers<[1], [0], [0], [1], [0, 0, 1, 1], [], []>} : vector<16x128xbf16>, vector<128x8xbf16>, vector<16x8xf32> -> vector<16x8xf32>
    %c0_21 = arith.constant 0 : index
    %c0_22 = arith.constant 0 : index
    %27 = vector.load %arg9[%c0_21, %c0_22] : memref<1x8xf32, #tpu.memory_space<vmem>>, vector<1x8xf32>
    %28 = vector.broadcast %27 : vector<1x8xf32> to vector<16x8xf32>
    %29 = arith.addf %26, %28 : vector<16x8xf32>
    %c0_23 = arith.constant 0 : index
    %c0_24 = arith.constant 0 : index
    %30 = vector.load %arg10[%c0_23, %c0_24] : memref<16x8xf32, #tpu.memory_space<vmem>>, vector<16x8xf32>
    tpu.vector_store %arg10[%c0_23, %c0_24], %29 {strides = array<i32>} : memref<16x8xf32, #tpu.memory_space<vmem>>, vector<16x8xf32>,
    return
  }
  func.func @transform_0(%arg0: i32) -> (i32, i32) {
    %c0_i32 = arith.constant 0 : i32
    %c0_i32_0 = arith.constant 0 : i32
    return %arg0, %c0_i32 : i32, i32
  }
  func.func @transform_1(%arg0: i32) -> (i32, i32) {
    %c0_i32 = arith.constant 0 : i32
    %c0_i32_0 = arith.constant 0 : i32
    %c0_i32_1 = arith.constant 0 : i32
    return %c0_i32, %c0_i32_0 : i32, i32
  }
  func.func @transform_2(%arg0: i32) -> (i32, i32) {
    %c0_i32 = arith.constant 0 : i32
    %c0_i32_0 = arith.constant 0 : i32
    %c0_i32_1 = arith.constant 0 : i32
    return %c0_i32, %c0_i32_0 : i32, i32
  }
  func.func @transform_3(%arg0: i32) -> (i32, i32) {
    %c0_i32 = arith.constant 0 : i32
    %c0_i32_0 = arith.constant 0 : i32
    %c0_i32_1 = arith.constant 0 : i32
    return %c0_i32, %c0_i32_0 : i32, i32
  }
  func.func @transform_4(%arg0: i32) -> (i32, i32) {
    %c0_i32 = arith.constant 0 : i32
    %c0_i32_0 = arith.constant 0 : i32
    %c0_i32_1 = arith.constant 0 : i32
    return %c0_i32, %c0_i32_0 : i32, i32
  }
  func.func @transform_5(%arg0: i32) -> (i32, i32) {
    %c0_i32 = arith.constant 0 : i32
    %c0_i32_0 = arith.constant 0 : i32
    %c0_i32_1 = arith.constant 0 : i32
    return %c0_i32, %c0_i32_0 : i32, i32
  }
  func.func @transform_6(%arg0: i32) -> (i32, i32) {
    %c0_i32 = arith.constant 0 : i32
    %c0_i32_0 = arith.constant 0 : i32
    %c0_i32_1 = arith.constant 0 : i32
    return %c0_i32, %c0_i32_0 : i32, i32
  }
  func.func @transform_7(%arg0: i32) -> (i32, i32) {
    %c0_i32 = arith.constant 0 : i32
    %c0_i32_0 = arith.constant 0 : i32
    %c0_i32_1 = arith.constant 0 : i32
    return %c0_i32, %c0_i32_0 : i32, i32
  }
  func.func @transform_8(%arg0: i32) -> (i32, i32) {
    %c0_i32 = arith.constant 0 : i32
    %c0_i32_0 = arith.constant 0 : i32
    %c0_i32_1 = arith.constant 0 : i32
    return %c0_i32, %c0_i32_0 : i32, i32
  }
  func.func @transform_9(%arg0: i32) -> (i32, i32) {
    %c0_i32 = arith.constant 0 : i32
    %c0_i32_0 = arith.constant 0 : i32
    return %arg0, %c0_i32 : i32, i32
  }
}

</mosaic_0001>

<bundles_post_ra>
// kernel: tpu_custom_call.1
= control target key start
LH: loop header
LB: loop body
LE: loop exit
PB: predicated region body
PF: predicated region fallthrough
CT: control target
= control target key end

     0   :  { %14 = vsyncpa [#allocation3], 0  ;;  %s895_s0 = inlined_call_operand.vmem [shape: bf16[16,32], index: 0, kind: input, shape index: {}]   ;;  %s896_s1 = inlined_call_operand.hbm [shape: bf16[32,128], index: 1, kind: input, shape index: {}]   ;;  %s897_s2 = inlined_call_operand.vmem [shape: f32[1,128], index: 2, kind: input, shape index: {}]   ;;  %s898_s3 = inlined_call_operand.vmem [shape: bf16[128,128], index: 3, kind: input, shape index: {}]   ;;  %s899_s4 = inlined_call_operand.hbm [shape: f32[1,128], index: 4, kind: input, shape index: {}]   ;;  %s900_s5 = inlined_call_operand.hbm [shape: bf16[128,128], index: 5, kind: input, shape index: {}]   ;;  %s901_s6 = inlined_call_operand.vmem [shape: f32[1,128], index: 6, kind: input, shape index: {}]   ;;  %s902_s7 = inlined_call_operand.vmem [shape: bf16[128,8], index: 7, kind: input, shape index: {}]   ;;  %s903_s8 = inlined_call_operand.vmem [shape: f32[1,8], index: 8, kind: input, shape index: {}]   ;;  %s904_s9 = inlined_call_operand.vmem [shape: f32[16,8], index: 9, kind: output, shape index: {}]  }
   0x1   :  { %15 = vsyncpa [#allocation5], 0  ;;  %s729_s30 = smov [#allocation4]   ;;  %s730_s11 = smov [#allocation2]  }
   0x2   :  { %s40_s10 = sshll.u32 %s729_s30, 4  ;;  %s23_s12 = sshll.u32 %s730_s11, 4  ;;  %s41_s10 = int_to_ptr.vmem [resolvable:$true] %s40_s10  ;;  %s24_s12 = int_to_ptr.vmem [resolvable:$true] %s23_s12 }
   0x3   :  { %s673_s13 = scalar_lea.vmem %s41_s10, 16  ;;  %s677_s14 = scalar_lea.vmem %s41_s10, 32 }
   0x4   :  { %p674_p0 = scmp.ne.s32.totalorder %s41_s10, %s673_s13  ;;  %p678_p1 = scmp.lt.s32.totalorder %s41_s10, %s41_s10 }
   0x5   :  { %p679_p2 = scmp.lt.s32.totalorder %s677_s14, %s673_s13 }
   0x7   :  { %p680_p3 = por %p679_p2, %p678_p1 }
   0x9   :  { %p681_p4 = pnand %p680_p3, %p674_p0 }
   0xb   :  { %684 = shalt.err (!%p681_p4)
}
   0xc   :  { %43 = dma.hbm_to_vmem [thread:$0]  %s899_s4, 16, %s41_s10, [#allocation5]  }
   0xd   :  { %s693_s17 = scalar_lea.vmem %s24_s12, 256  ;;  %p698_p6 = scmp.lt.s32.totalorder %s24_s12, %s24_s12 }
   0xe   :  { %p694_p5 = scmp.ne.s32.totalorder %s24_s12, %s693_s17  ;;  %p699_p7 = scmp.lt.s32.totalorder %s693_s17, %s693_s17 }
  0x10   :  { %p700_p8 = por %p699_p7, %p698_p6 }
  0x12   :  { %p701_p9 = pnand %p700_p8, %p694_p5 }
  0x14   :  { %704 = shalt.err (!%p701_p9)
}
  0x15   :  { %s731_s18 = smov 64   ;;  %s732_s19 = smov 4  }
  0x16   :  { %29 = dma.hbm_to_vmem [thread:$0]  %s896_s1, 256, %s24_s12, [#allocation3], %s731_s18, %s731_s18, %s732_s19  }
  0x17   :  { %s733_s22 = smov [#allocation6]  }
  0x18   :  { %s49_s23 = sshll.u32 %s733_s22, 4  ;;  %s50_s23 = int_to_ptr.vmem [resolvable:$true] %s49_s23 }
  0x19   :  { %s713_s24 = scalar_lea.vmem %s50_s23, 1024  ;;  %p718_p11 = scmp.lt.s32.totalorder %s50_s23, %s50_s23 }
  0x1a   :  { %p714_p10 = scmp.ne.s32.totalorder %s50_s23, %s713_s24  ;;  %p719_p12 = scmp.lt.s32.totalorder %s713_s24, %s713_s24 }
  0x1c   :  { %p720_p13 = por %p719_p12, %p718_p11 }
  0x1e   :  { %p721_p0 = pnand %p720_p13, %p714_p10 }
  0x20   :  { %724 = shalt.err (!%p721_p0)
}
  0x21   :  { %55 = dma.hbm_to_vmem [thread:$0]  %s900_s5, 1024, %s50_s23, [#allocation5], %s731_s18, %s731_s18, %s732_s19  }
  0x22   :  { %725 = dma.done.wait [#allocation3], 256  }
  0x23   :  { %726 = vsyncadd [#allocation3], 4294967040 }
  0x24   :  { %727 = dma.done.wait [#allocation5], 1040  }
  0x25   :  { %728 = vsyncadd [#allocation5], 4294966256  ;;  %v734_v0 = vmov 0.0   ;;  %vm735_vm0 = vmmov 0   ;;  %v638_v1 = vld [vmem:[#allocation2 + $0x8] sm:$0xff]   ;;  %v639_v2 = vld [vmem:[#allocation2] sm:$0xff]  }
  0x26   :  { %563 = vmatprep.subr.bf16.mxu0 %v734_v0  ;;  %567 = vmatprep.mubr.msk.bf16.mxu0 %vm735_vm0, %v734_v0  ;;  %v641_v3 = vld [vmem:[%s898_s3 + $0x38] sm:$0xff]   ;;  %v640_v4 = vld [vmem:[%s895_s0] sm:$0xff]   ;;  %v642_v5 = vld [vmem:[%s898_s3 + $0x30] sm:$0xff]   ;;  %vm102_vm1 = vcmask 261120   ;;  %vm492_vm2 = vcmask 64512  }
  0x27   :  { %571 = vmatprep.subr.bf16.mxu1 %v734_v0  ;;  %587 = vmatprep.mubr.msk.bf16.mxu1 %vm735_vm0, %v734_v0  ;;  %v643_v6 = vld [vmem:[%s898_s3 + $0x28] sm:$0xff]   ;;  %v644_v7 = vld [vmem:[%s898_s3 + $0x20] sm:$0xff]   ;;  %v645_v8 = vld [vmem:[%s898_s3 + $0x18] sm:$0xff]  }
  0x28   :  { %564 = vmatpush3.bf16.msra.mxu0 %v638_v1  ;;  %572 = vmatpush3.bf16.msra.mxu1 %v641_v3  ;;  %v646_v9 = vld [vmem:[%s898_s3 + $0x10] sm:$0xff]   ;;  %v647_v10 = vld [vmem:[%s898_s3 + $0x8] sm:$0xff]   ;;  %v648_v11 = vld [vmem:[%s898_s3] sm:$0xff]  }
  0x29   :  { %565 = vmatprep.subr.bf16.mxu0 %v734_v0  ;;  %573 = vmatprep.subr.bf16.mxu1 %v734_v0  ;;  %v649_v12 = vld [vmem:[#allocation6 + $0x38] sm:$0xff]   ;;  %v650_v13 = vld [vmem:[#allocation6 + $0x30] sm:$0xff]   ;;  %v651_v14 = vld [vmem:[#allocation6 + $0x28] sm:$0xff]  }
  0x2a   :  { %v652_v15 = vld [vmem:[#allocation6 + $0x20] sm:$0xff]   ;;  %v653_v16 = vld [vmem:[#allocation6 + $0x18] sm:$0xff]   ;;  %v501_v17 = vld [vmem:[%s897_s2] ss:$0 sm:$0xff] }
  0x2b   :  { %v654_v27 = vld [vmem:[#allocation6 + $0x10] sm:$0xff]   ;;  %v655_v28 = vld [vmem:[#allocation6 + $0x8] sm:$0xff]   ;;  %v656_v29 = vld [vmem:[#allocation6] sm:$0xff]  }
  0x2c   :  { %566 = vmatpush3.bf16.msra.mxu0 %v639_v2  ;;  %574 = vmatpush3.bf16.msra.mxu1 %v642_v5  ;;  %v657_v30 = vld [vmem:[%s902_s7 + $0x38] sm:$0xff]   ;;  %v658_v31 = vld [vmem:[%s902_s7 + $0x30] sm:$0xff]   ;;  %v659_v32 = vld [vmem:[%s902_s7 + $0x28] sm:$0xff]  }
  0x2d   :  { %591 = vmatprep.subr.bf16.mxu0 %v734_v0  ;;  %575 = vmatprep.subr.bf16.mxu1 %v734_v0  ;;  %v660_v33 = vld [vmem:[%s902_s7 + $0x20] sm:$0xff]   ;;  %v661_v34 = vld [vmem:[%s902_s7 + $0x18] sm:$0xff]   ;;  %v506_v35 = vld [vmem:[#allocation4] ss:$0 sm:$0xff] }
  0x2e   :  { %v662_v45 = vld [vmem:[%s902_s7 + $0x10] sm:$0xff]   ;;  %v663_v46 = vld [vmem:[%s902_s7 + $0x8] sm:$0xff]   ;;  %v664_v47 = vld [vmem:[%s902_s7] sm:$0xff]  }
  0x2f   :  { %568 = vmatmul.mubr.msk.bf16.vlgmr.msra.gmra.mxu0 %vm102_vm1, %v640_v4  ;;  %v515_v48 = vld [vmem:[%s901_s6] ss:$0 sm:$0xff] }
  0x30   :  { %607 = vmatprep.mubr.msk.bf16.mxu0 %vm735_vm0, %v734_v0  ;;  %576 = vmatpush3.bf16.msra.mxu1 %v643_v6  ;;  %v524_v58 = vld [vmem:[%s903_s8] ss:$0 sm:$0xff] }
  0x31   :  { %577 = vmatprep.subr.bf16.mxu1 %v734_v0  ;;  %592 = vmatpush3.bf16.msra.mxu0 %v649_v12 }
  0x32   :  { %593 = vmatprep.subr.bf16.mxu0 %v734_v0 }
  0x34   :  { %578 = vmatpush3.bf16.msra.mxu1 %v644_v7 }
  0x35   :  { %579 = vmatprep.subr.bf16.mxu1 %v734_v0  ;;  %594 = vmatpush3.bf16.msra.mxu0 %v650_v13 }
  0x36   :  { %595 = vmatprep.subr.bf16.mxu0 %v734_v0 }
  0x38   :  { %580 = vmatpush3.bf16.msra.mxu1 %v645_v8 }
  0x39   :  { %581 = vmatprep.subr.bf16.mxu1 %v734_v0  ;;  %596 = vmatpush3.bf16.msra.mxu0 %v651_v14 }
  0x3a   :  { %597 = vmatprep.subr.bf16.mxu0 %v734_v0 }
  0x3c   :  { %582 = vmatpush3.bf16.msra.mxu1 %v646_v9 }
  0x3d   :  { %583 = vmatprep.subr.bf16.mxu1 %v734_v0  ;;  %598 = vmatpush3.bf16.msra.mxu0 %v652_v15 }
  0x3e   :  { %599 = vmatprep.subr.bf16.mxu0 %v734_v0 }
  0x40   :  { %584 = vmatpush3.bf16.msra.mxu1 %v647_v10 }
  0x41   :  { %585 = vmatprep.subr.bf16.mxu1 %v734_v0  ;;  %600 = vmatpush3.bf16.msra.mxu0 %v653_v16 }
  0x42   :  { %601 = vmatprep.subr.bf16.mxu0 %v734_v0 }
  0x44   :  { %586 = vmatpush3.bf16.msra.mxu1 %v648_v11 }
  0x45   :  { %611 = vmatprep.subr.bf16.mxu1 %v734_v0  ;;  %602 = vmatpush3.bf16.msra.mxu0 %v654_v27 }
  0x46   :  { %603 = vmatprep.subr.bf16.mxu0 %v734_v0 }
  0x49   :  { %604 = vmatpush3.bf16.msra.mxu0 %v655_v28 }
  0x4a   :  { %605 = vmatprep.subr.bf16.mxu0 %v734_v0 }
  0x4d   :  { %606 = vmatpush3.bf16.msra.mxu0 %v656_v29 }
  0xef   :  { %v140_v18 = vpop.f32.mrf.mxu0 }
  0xf0   :  { %v141_v20 = vadd.f32 %v501_v17, %v140_v18 }
  0xf1   :  { %v569_v19 = vpop.f32.mrf.mxu0 }
  0xf2   :  { %v147_v24 = vmax.f32 %v141_v20, 0.0 }
  0xf3   :  { %v143_v21 = vpop.f32.mrf.mxu0 }
  0xf4   :  { %v144_v22 = vadd.f32 %v501_v17, %v143_v21 }
  0xf5   :  { %v570_v23 = vpop.f32.mrf.mxu0 }
  0xf6   :  { %v148_v25 = vmax.f32 %v144_v22, 0.0 }
  0xf8   :  { %v149_v26 = vpack.c.bf16 %v148_v25, %v147_v24 }
  0xfa   :  { %588 = vmatmul.mubr.bf16.vlgmr.msra.gmra.mxu1 %v149_v26 }
  0xfb   :  { %627 = vmatprep.mubr.msk.bf16.mxu1 %vm735_vm0, %v734_v0  ;;  %612 = vmatpush3.bf16.msra.mxu1 %v657_v30 }
  0xfc   :  { %613 = vmatprep.subr.bf16.mxu1 %v734_v0 }
  0xff   :  { %614 = vmatpush3.bf16.msra.mxu1 %v658_v31 }
 0x100   :  { %615 = vmatprep.subr.bf16.mxu1 %v734_v0 }
 0x103   :  { %616 = vmatpush3.bf16.msra.mxu1 %v659_v32 }
 0x104   :  { %617 = vmatprep.subr.bf16.mxu1 %v734_v0 }
 0x107   :  { %618 = vmatpush3.bf16.msra.mxu1 %v660_v33 }
 0x108   :  { %619 = vmatprep.subr.bf16.mxu1 %v734_v0 }
 0x10b   :  { %620 = vmatpush3.bf16.msra.mxu1 %v661_v34 }
 0x10c   :  { %621 = vmatprep.subr.bf16.mxu1 %v734_v0 }
 0x10f   :  { %622 = vmatpush3.bf16.msra.mxu1 %v662_v45 }
 0x110   :  { %623 = vmatprep.subr.bf16.mxu1 %v734_v0 }
 0x113   :  { %624 = vmatpush3.bf16.msra.mxu1 %v663_v46 }
 0x114   :  { %625 = vmatprep.subr.bf16.mxu1 %v734_v0 }
 0x117   :  { %626 = vmatpush3.bf16.msra.mxu1 %v664_v47 }
 0x1ba   :  { %v255_v36 = vpop.f32.mrf.mxu1 }
 0x1bb   :  { %v256_v38 = vadd.f32 %v506_v35, %v255_v36 }
 0x1bc   :  { %v589_v37 = vpop.f32.mrf.mxu1 }
 0x1bd   :  { %v262_v42 = vmax.f32 %v256_v38, 0.0 }
 0x1be   :  { %v258_v39 = vpop.f32.mrf.mxu1 }
 0x1bf   :  { %v259_v40 = vadd.f32 %v506_v35, %v258_v39 }
 0x1c0   :  { %v590_v41 = vpop.f32.mrf.mxu1 }
 0x1c1   :  { %v263_v43 = vmax.f32 %v259_v40, 0.0 }
 0x1c3   :  { %v264_v44 = vpack.c.bf16 %v263_v43, %v262_v42 }
 0x1c5   :  { %608 = vmatmul.mubr.bf16.vlgmr.msra.gmra.mxu0 %v264_v44 }
 0x285   :  { %v370_v49 = vpop.f32.mrf.mxu0 }
 0x286   :  { %v371_v51 = vadd.f32 %v515_v48, %v370_v49 }
 0x287   :  { %v609_v50 = vpop.f32.mrf.mxu0 }
 0x288   :  { %v377_v55 = vmax.f32 %v371_v51, 0.0 }
 0x289   :  { %v373_v52 = vpop.f32.mrf.mxu0 }
 0x28a   :  { %v374_v53 = vadd.f32 %v515_v48, %v373_v52 }
 0x28b   :  { %v610_v54 = vpop.f32.mrf.mxu0 }
 0x28c   :  { %v378_v56 = vmax.f32 %v374_v53, 0.0 }
 0x28e   :  { %v379_v57 = vpack.c.bf16 %v378_v56, %v377_v55 }
 0x290   :  { %628 = vmatmul.mubr.bf16.vlgmr.msra.gmra.mxu1 %v379_v57 }
 0x350   :  { %v485_v59 = vpop.f32.mrf.mxu1 }
 0x351   :  { %v486_v60 = vadd.f32 %v524_v58, %v485_v59 }
 0x352   :  { %v629_v61 = vpop.f32.mrf.mxu1 }
 0x353   :  { %493 = vst.msk [vmem:[%s904_s9] sm:$0xff] %vm492_vm2, %v486_v60 }
 0x354   :  { %v488_v62 = vpop.f32.mrf.mxu1 }
 0x355   :  { %v489_v63 = vadd.f32 %v524_v58, %v488_v62 }
 0x356   :  { %v630_v0 = vpop.f32.mrf.mxu1 }
 0x357   :  { %494 = vst.msk [vmem:[%s904_s9 + $0x8] sm:$0xff] %vm492_vm2, %v489_v63 }
 0x358   :  { %499 = vsyncpa [#allocation3], 1 }
 0x359   :  { %500 = vsyncpa [#allocation5], 1 }

</bundles_post_ra>
